<compile_context>
chip_gen: v6e
topology: v6e:2x2x1
jax: 0.10.0
libtpu: 0.0.40
codegen_flags: <defaults>
</compile_context>

<pallas_src>
import jax
import jax.numpy as jnp
from jax.experimental import pallas as pl
from jax.experimental.pallas import tpu as pltpu

H1 = 256   # shared[0]: Linear(input_dim, 256)
H2 = 128   # shared[4]: Linear(256, 128)
BN_EPS = 1e-5


def _round_up(n, m):
    return (n + m - 1) // m * m


def _mtrank_kernel(x_ref, w1_ref, b1_ref, w2_ref, b2_ref, wh_ref, bh_ref,
                   out_ref):
    # x arrives in native f32 (no extra HBM cast/pad pass); cast to bf16 on the
    # VPU right before the MXU.
    x = x_ref[...].astype(jnp.bfloat16)

    # shared[0] Linear + shared[1] BatchNorm (folded into w1/b1) + shared[2] ReLU
    # (shared[3] Dropout(0.3) is identity in eval mode)
    h = jnp.dot(x, w1_ref[...], preferred_element_type=jnp.float32)
    h = jnp.maximum(h + b1_ref[...], 0.0)

    # shared[4] Linear(256, 128) + shared[5] ReLU
    h2 = jnp.dot(h.astype(jnp.bfloat16), w2_ref[...],
                 preferred_element_type=jnp.float32)
    h2 = jnp.maximum(h2 + b2_ref[...], 0.0)

    # Heads stay off the MXU (an N=2 RHS still costs a full-width matmul's
    # pushes): VPU broadcast-multiply + lane reduction per head, f32 throughout.
    score = jnp.sum(h2 * wh_ref[0:1, :], axis=-1) + bh_ref[0]   # (tb,)
    logit = jnp.sum(h2 * wh_ref[1:2, :], axis=-1) + bh_ref[1]   # (tb,)

    # Lane-dense (2, tb) output: row 0 = rank score, row 1 = class probability.
    out_ref[0, :] = score
    out_ref[1, :] = jax.nn.sigmoid(logit)


def _choose_tile(B, tile_b):
    if B <= 128:
        # Single program; block == full batch so no alignment padding needed.
        return B
    tile_b = max(128, _round_up(tile_b, 128))
    # v7x has 2 TensorCores: cap the tile so the grid always has >= 2 programs.
    half = _round_up(pl.cdiv(B, 2), 128)
    return min(tile_b, half)


def multitask_ranknet_forward(x, params, *, tile_b=1024):
    """x: (B, D) float32.  Returns (score (B,), prob (B,)) — eval-mode forward."""
    B, D = x.shape
    tb = _choose_tile(B, tile_b)
    grid = (pl.cdiv(B, tb),)   # partial last block: OOB rows are garbage-read /
                               # masked-write; safe because every op is row-wise.

    # Fold eval-mode BatchNorm1d(256) into the first Linear.
    # NOTE: folded in f32 then cast to bf16 for the MXU; if bn_var could be
    # pathologically tiny, keep w1_f in f32 instead (precision, not overflow).
    bn_scale = params["bn_gamma"] * jax.lax.rsqrt(params["bn_var"] + BN_EPS)
    bn_shift = params["bn_beta"] - params["bn_mean"] * bn_scale
    w1_f = params["w1"].T * bn_scale[None, :]                  # (D, H1)
    b1_f = params["b1"] * bn_scale + bn_shift                  # (H1,)

    w2t = params["w2"].T                                       # (H1, H2)
    wh = jnp.concatenate([params["w_rank"], params["w_class"]], axis=0)  # (2, H2)
    bh = jnp.concatenate([params["b_rank"], params["b_class"]], axis=0)  # (2,)

    row = lambda v: v.reshape(1, -1).astype(jnp.float32)
    bf16 = lambda v: v.astype(jnp.bfloat16)
    bcast = lambda shape: pl.BlockSpec(shape, lambda i: (0, 0))

    out = pl.pallas_call(
        _mtrank_kernel,
        out_shape=jax.ShapeDtypeStruct((2, B), jnp.float32),
        grid=grid,
        in_specs=[
            pl.BlockSpec((tb, D), lambda i: (i, 0)),           # x, native f32
            bcast((D, H1)),                                    # BN-folded w1^T (bf16)
            bcast((1, H1)),                                    # BN-folded b1 (f32)
            bcast((H1, H2)),                                   # w2^T (bf16)
            bcast((1, H2)),                                    # b2 (f32)
            bcast((2, H2)),                                    # [w_rank; w_class] (f32)
            pl.BlockSpec(memory_space=pltpu.MemorySpace.SMEM), # head biases (2,) f32
        ],
        out_specs=pl.BlockSpec((2, tb), lambda i: (0, i)),     # lane-dense output
        compiler_params=pltpu.CompilerParams(
            dimension_semantics=("parallel",),
            vmem_limit_bytes=32 * 1024 * 1024),
    )(x.astype(jnp.float32), bf16(w1_f), row(b1_f), bf16(w2t),
      row(params["b2"]), wh.astype(jnp.float32), bh.astype(jnp.float32))

    return out[0], out[1]


def init_params(input_dim, key):
    """Deterministic synthetic parameters with the module's shapes."""
    ks = jax.random.split(key, 8)
    u = lambda k, shape, bound: jax.random.uniform(
        k, shape, jnp.float32, -bound, bound)
    return {
        "w1": u(ks[0], (H1, input_dim), 1.0 / jnp.sqrt(input_dim)),
        "b1": u(ks[1], (H1,), 1.0 / jnp.sqrt(input_dim)),
        "bn_gamma": jnp.ones((H1,), jnp.float32),
        "bn_beta": jnp.zeros((H1,), jnp.float32),
        "bn_mean": jnp.zeros((H1,), jnp.float32),
        "bn_var": jnp.ones((H1,), jnp.float32),
        "w2": u(ks[2], (H2, H1), 1.0 / jnp.sqrt(H1)),
        "b2": u(ks[3], (H2,), 1.0 / jnp.sqrt(H1)),
        "w_rank": u(ks[4], (1, H2), 1.0 / jnp.sqrt(H2)),
        "b_rank": u(ks[5], (1,), 1.0 / jnp.sqrt(H2)),
        "w_class": u(ks[6], (1, H2), 1.0 / jnp.sqrt(H2)),
        "b_class": u(ks[7], (1,), 1.0 / jnp.sqrt(H2)),
    }


if __name__ == "__main__":
    B, D = 8, 32
    root = jax.random.PRNGKey(0)
    k_x, k_p = jax.random.split(root)
    x = jax.random.normal(k_x, (B, D), jnp.float32)
    params = init_params(D, k_p)

    score, prob = multitask_ranknet_forward(x, params)
    jax.block_until_ready((score, prob))

    # Pure-JAX f32 reference (eval-mode semantics).
    def ref(x, p):
        h = x @ p["w1"].T + p["b1"]
        s = p["bn_gamma"] / jnp.sqrt(p["bn_var"] + BN_EPS)
        h = (h - p["bn_mean"]) * s + p["bn_beta"]
        h = jnp.maximum(h, 0.0)
        h = jnp.maximum(h @ p["w2"].T + p["b2"], 0.0)
        sc = (h @ p["w_rank"].T + p["b_rank"])[:, 0]
        pr = jax.nn.sigmoid((h @ p["w_class"].T + p["b_class"])[:, 0])
        return sc, pr

    sc_ref, pr_ref = ref(x, params)
    assert score.shape == (B,) and prob.shape == (B,)
    # bf16 MXU operands with f32 accumulation -> relaxed tolerance.
    assert jnp.allclose(score, sc_ref, atol=5e-2, rtol=5e-2)
    assert jnp.allclose(prob, pr_ref, atol=5e-2, rtol=5e-2)
    print("KERNEL_OK")
</pallas_src>

<mosaic_0001>
module attributes {stable_mosaic.version = 11 : i64} {
  func.func @_mtrank_kernel(%arg0: i32, %arg1: memref<8x32xf32, #tpu.memory_space<vmem>>, %arg2: memref<32x256xbf16, #tpu.memory_space<vmem>>, %arg3: memref<1x256xf32, #tpu.memory_space<vmem>>, %arg4: memref<256x128xbf16, #tpu.memory_space<vmem>>, %arg5: memref<1x128xf32, #tpu.memory_space<vmem>>, %arg6: memref<2x128xf32, #tpu.memory_space<vmem>>, %arg7: memref<2xf32, #tpu.memory_space<smem>>, %arg8: memref<2x8xf32, #tpu.memory_space<vmem>>) attributes {dimension_semantics = [#tpu.dimension_semantics<parallel>], iteration_bounds = array<i64: 1>, scalar_prefetch = 0 : i64, scratch_operands = 0 : i64, tpu.core_type = #tpu.core_type<tc>, window_params = [{transform_indices = @transform_0, window_bounds = array<i64: 8, 32>}, {pipeline_mode = #tpu.pipeline_mode<synchronous>, transform_indices = @transform_1, window_bounds = array<i64: 32, 256>}, {pipeline_mode = #tpu.pipeline_mode<synchronous>, transform_indices = @transform_2, window_bounds = array<i64: 1, 256>}, {pipeline_mode = #tpu.pipeline_mode<synchronous>, transform_indices = @transform_3, window_bounds = array<i64: 256, 128>}, {pipeline_mode = #tpu.pipeline_mode<synchronous>, transform_indices = @transform_4, window_bounds = array<i64: 1, 128>}, {pipeline_mode = #tpu.pipeline_mode<synchronous>, transform_indices = @transform_5, window_bounds = array<i64: 2, 128>}, {transform_indices = @transform_6, window_bounds = array<i64: 2>}, {transform_indices = @transform_7, window_bounds = array<i64: 2, 8>}]} {
    %c0 = arith.constant 0 : index
    %c0_0 = arith.constant 0 : index
    %0 = vector.load %arg1[%c0, %c0_0] : memref<8x32xf32, #tpu.memory_space<vmem>>, vector<8x32xf32>
    %1 = arith.truncf %0 : vector<8x32xf32> to vector<8x32xbf16>
    %c0_1 = arith.constant 0 : index
    %c0_2 = arith.constant 0 : index
    %2 = vector.load %arg2[%c0_1, %c0_2] : memref<32x256xbf16, #tpu.memory_space<vmem>>, vector<32x256xbf16>
    %cst = arith.constant dense<0.000000e+00> : vector<8x256xf32>
    %3 = tpu.matmul %1, %2, %cst {dimension_numbers = #tpu.dot_dimension_numbers<[1], [0], [0], [1], [0, 0, 1, 1], [], []>} : vector<8x32xbf16>, vector<32x256xbf16>, vector<8x256xf32> -> vector<8x256xf32>
    %c0_3 = arith.constant 0 : index
    %c0_4 = arith.constant 0 : index
    %4 = vector.load %arg3[%c0_3, %c0_4] : memref<1x256xf32, #tpu.memory_space<vmem>>, vector<1x256xf32>
    %5 = vector.broadcast %4 : vector<1x256xf32> to vector<8x256xf32>
    %6 = arith.addf %3, %5 : vector<8x256xf32>
    %cst_5 = arith.constant 0.000000e+00 : f32
    %7 = vector.broadcast %cst_5 : f32 to vector<8x256xf32>
    %8 = arith.maximumf %6, %7 : vector<8x256xf32>
    %9 = arith.truncf %8 : vector<8x256xf32> to vector<8x256xbf16>
    %c0_6 = arith.constant 0 : index
    %c0_7 = arith.constant 0 : index
    %10 = vector.load %arg4[%c0_6, %c0_7] : memref<256x128xbf16, #tpu.memory_space<vmem>>, vector<256x128xbf16>
    %cst_8 = arith.constant dense<0.000000e+00> : vector<8x128xf32>
    %11 = tpu.matmul %9, %10, %cst_8 {dimension_numbers = #tpu.dot_dimension_numbers<[1], [0], [0], [1], [0, 0, 1, 1], [], []>} : vector<8x256xbf16>, vector<256x128xbf16>, vector<8x128xf32> -> vector<8x128xf32>
    %c0_9 = arith.constant 0 : index
    %c0_10 = arith.constant 0 : index
    %12 = vector.load %arg5[%c0_9, %c0_10] : memref<1x128xf32, #tpu.memory_space<vmem>>, vector<1x128xf32>
    %13 = vector.broadcast %12 : vector<1x128xf32> to vector<8x128xf32>
    %14 = arith.addf %11, %13 : vector<8x128xf32>
    %cst_11 = arith.constant 0.000000e+00 : f32
    %15 = vector.broadcast %cst_11 : f32 to vector<8x128xf32>
    %16 = arith.maximumf %14, %15 : vector<8x128xf32>
    %c0_12 = arith.constant 0 : index
    %c0_13 = arith.constant 0 : index
    %17 = vector.load %arg6[%c0_12, %c0_13] : memref<2x128xf32, #tpu.memory_space<vmem>>, vector<1x128xf32>
    %18 = vector.broadcast %17 : vector<1x128xf32> to vector<8x128xf32>
    %19 = arith.mulf %16, %18 : vector<8x128xf32>
    %cst_14 = arith.constant dense<0.000000e+00> : vector<8xf32>
    %20 = vector.multi_reduction <add>, %19, %cst_14 [1] : vector<8x128xf32> to vector<8xf32>
    %c0_15 = arith.constant 0 : index
    %21 = memref.load %arg7[%c0_15] : memref<2xf32, #tpu.memory_space<smem>>
    %22 = vector.broadcast %21 : f32 to vector<8xf32>
    %23 = arith.addf %20, %22 : vector<8xf32>
    %c1 = arith.constant 1 : index
    %c0_16 = arith.constant 0 : index
    %24 = vector.load %arg6[%c1, %c0_16] : memref<2x128xf32, #tpu.memory_space<vmem>>, vector<1x128xf32>
    %25 = vector.broadcast %24 : vector<1x128xf32> to vector<8x128xf32>
    %26 = arith.mulf %16, %25 : vector<8x128xf32>
    %cst_17 = arith.constant dense<0.000000e+00> : vector<8xf32>
    %27 = vector.multi_reduction <add>, %26, %cst_17 [1] : vector<8x128xf32> to vector<8xf32>
    %c1_18 = arith.constant 1 : index
    %28 = memref.load %arg7[%c1_18] : memref<2xf32, #tpu.memory_space<smem>>
    %29 = vector.broadcast %28 : f32 to vector<8xf32>
    %30 = arith.addf %27, %29 : vector<8xf32>
    %c0_19 = arith.constant 0 : index
    %c0_20 = arith.constant 0 : index
    %31 = vector.load %arg8[%c0_19, %c0_20] : memref<2x8xf32, #tpu.memory_space<vmem>>, vector<1x8xf32>
    %32 = vector.shape_cast %31 : vector<1x8xf32> to vector<8xf32>
    %33 = vector.shape_cast %23 : vector<8xf32> to vector<1x8xf32>
    tpu.vector_store %arg8[%c0_19, %c0_20], %33 {strides = array<i32>} : memref<2x8xf32, #tpu.memory_space<vmem>>, vector<1x8xf32>,
    %34 = arith.negf %30 : vector<8xf32>
    %35 = math.exp %34 : vector<8xf32>
    %cst_21 = arith.constant 1.000000e+00 : f32
    %36 = vector.broadcast %cst_21 : f32 to vector<8xf32>
    %37 = arith.addf %36, %35 : vector<8xf32>
    %38 = arith.divf %36, %37 : vector<8xf32>
    %c1_22 = arith.constant 1 : index
    %c0_23 = arith.constant 0 : index
    %39 = vector.load %arg8[%c1_22, %c0_23] : memref<2x8xf32, #tpu.memory_space<vmem>>, vector<1x8xf32>
    %40 = vector.shape_cast %39 : vector<1x8xf32> to vector<8xf32>
    %41 = vector.shape_cast %38 : vector<8xf32> to vector<1x8xf32>
    tpu.vector_store %arg8[%c1_22, %c0_23], %41 {strides = array<i32>} : memref<2x8xf32, #tpu.memory_space<vmem>>, vector<1x8xf32>,
    return
  }
  func.func @transform_0(%arg0: i32) -> (i32, i32) {
    %c0_i32 = arith.constant 0 : i32
    %c0_i32_0 = arith.constant 0 : i32
    return %arg0, %c0_i32 : i32, i32
  }
  func.func @transform_1(%arg0: i32) -> (i32, i32) {
    %c0_i32 = arith.constant 0 : i32
    %c0_i32_0 = arith.constant 0 : i32
    %c0_i32_1 = arith.constant 0 : i32
    return %c0_i32, %c0_i32_0 : i32, i32
  }
  func.func @transform_2(%arg0: i32) -> (i32, i32) {
    %c0_i32 = arith.constant 0 : i32
    %c0_i32_0 = arith.constant 0 : i32
    %c0_i32_1 = arith.constant 0 : i32
    return %c0_i32, %c0_i32_0 : i32, i32
  }
  func.func @transform_3(%arg0: i32) -> (i32, i32) {
    %c0_i32 = arith.constant 0 : i32
    %c0_i32_0 = arith.constant 0 : i32
    %c0_i32_1 = arith.constant 0 : i32
    return %c0_i32, %c0_i32_0 : i32, i32
  }
  func.func @transform_4(%arg0: i32) -> (i32, i32) {
    %c0_i32 = arith.constant 0 : i32
    %c0_i32_0 = arith.constant 0 : i32
    %c0_i32_1 = arith.constant 0 : i32
    return %c0_i32, %c0_i32_0 : i32, i32
  }
  func.func @transform_5(%arg0: i32) -> (i32, i32) {
    %c0_i32 = arith.constant 0 : i32
    %c0_i32_0 = arith.constant 0 : i32
    %c0_i32_1 = arith.constant 0 : i32
    return %c0_i32, %c0_i32_0 : i32, i32
  }
  func.func @transform_6(%arg0: i32) -> i32 {
    %c0_i32 = arith.constant 0 : i32
    %c0_i32_0 = arith.constant 0 : i32
    return %c0_i32 : i32
  }
  func.func @transform_7(%arg0: i32) -> (i32, i32) {
    %c0_i32 = arith.constant 0 : i32
    %c0_i32_0 = arith.constant 0 : i32
    return %c0_i32, %arg0 : i32, i32
  }
}

</mosaic_0001>

<bundles_post_ra>
// kernel: tpu_custom_call.1
= control target key start
LH: loop header
LB: loop body
LE: loop exit
PB: predicated region body
PF: predicated region fallthrough
CT: control target
= control target key end

     0   :  { %12 = vsyncpa [#allocation3], 0  ;;  %s666_s0 = inlined_call_operand.hbm [shape: f32[8,32], index: 0, kind: input, shape index: {}]   ;;  %s667_s1 = inlined_call_operand.hbm [shape: bf16[32,256], index: 1, kind: input, shape index: {}]   ;;  %s668_s2 = inlined_call_operand.vmem [shape: f32[1,256], index: 2, kind: input, shape index: {}]   ;;  %s669_s3 = inlined_call_operand.hbm [shape: bf16[256,128], index: 3, kind: input, shape index: {}]   ;;  %s670_s4 = inlined_call_operand.vmem [shape: f32[1,128], index: 4, kind: input, shape index: {}]   ;;  %s671_s5 = inlined_call_operand.vmem [shape: f32[2,128], index: 5, kind: input, shape index: {}]   ;;  %s672_s6 = inlined_call_operand.vmem [shape: f32[2], index: 6, kind: input, shape index: {}]   ;;  %s673_s7 = inlined_call_operand.hbm [shape: f32[2,8], index: 7, kind: output, shape index: {}]  }
   0x1   :  { %13 = vsyncpa [#allocation7], 0 }
   0x2   :  { %14 = vsyncpa [#allocation5], 0 }
   0x3   :  { %15 = vsyncpa [#allocation4], 0  ;;  %s589_s24 = smov [#allocation6]  }
   0x4   :  { %s31_s25 = sshll.u32 %s589_s24, 4  ;;  %s32_s25 = int_to_ptr.vmem [resolvable:$true] %s31_s25 }
   0x5   :  { %s497_s26 = scalar_lea.vmem %s32_s25, 512  ;;  %p502_p1 = scmp.lt.s32.totalorder %s32_s25, %s32_s25 }
   0x6   :  { %p498_p0 = scmp.ne.s32.totalorder %s32_s25, %s497_s26  ;;  %p503_p2 = scmp.lt.s32.totalorder %s497_s26, %s497_s26 }
   0x8   :  { %p504_p3 = por %p503_p2, %p502_p1 }
   0xa   :  { %p505_p4 = pnand %p504_p3, %p498_p0 }
   0xc   :  { %508 = shalt.err (!%p505_p4)
}
   0xd   :  { %s590_s27 = smov 128   ;;  %s591_s28 = smov 8  }
   0xe   :  { %37 = dma.hbm_to_vmem [thread:$0]  %s667_s1, 512, %s32_s25, [#allocation7], %s590_s27, %s590_s27, %s591_s28  }
   0xf   :  { %s592_s8 = smov [#allocation2]   ;;  %s593_s10 = smov [#allocation8]  }
  0x10   :  { %s22_s9 = sshll.u32 %s592_s8, 4  ;;  %s45_s11 = sshll.u32 %s593_s10, 4  ;;  %s23_s9 = int_to_ptr.vmem [resolvable:$true] %s22_s9  ;;  %s46_s11 = int_to_ptr.vmem [resolvable:$true] %s45_s11 }
  0x11   :  { %s517_s12 = scalar_lea.vmem %s23_s9, 128  ;;  %p522_p6 = scmp.lt.s32.totalorder %s23_s9, %s23_s9 }
  0x12   :  { %p518_p5 = scmp.ne.s32.totalorder %s23_s9, %s517_s12  ;;  %p523_p7 = scmp.lt.s32.totalorder %s517_s12, %s517_s12 }
  0x14   :  { %p524_p8 = por %p523_p7, %p522_p6 }
  0x16   :  { %p525_p9 = pnand %p524_p8, %p518_p5 }
  0x18   :  { %528 = shalt.err (!%p525_p9)
}
  0x19   :  { %25 = dma.hbm_to_vmem [thread:$0]  %s666_s0, 128, %s23_s9, [#allocation3]  }
  0x1a   :  { %s62_s1 = sshll.u32 %s672_s6, 4  ;;  %s537_s17 = scalar_lea.vmem %s46_s11, 2048  ;;  %s63_s1 = int_to_ptr.vmem [resolvable:$true] %s62_s1 }
  0x1b   :  { %p538_p10 = scmp.ne.s32.totalorder %s46_s11, %s537_s17  ;;  %p542_p11 = scmp.lt.s32.totalorder %s46_s11, %s46_s11 }
  0x1c   :  { %p543_p12 = scmp.lt.s32.totalorder %s537_s17, %s537_s17 }
  0x1e   :  { %p544_p13 = por %p543_p12, %p542_p11 }
  0x20   :  { %p545_p0 = pnand %p544_p13, %p538_p10 }
  0x22   :  { %548 = shalt.err (!%p545_p0)
}
  0x23   :  { %s594_s18 = smov 64   ;;  %s595_s19 = smov 4  }
  0x24   :  { %51 = dma.hbm_to_vmem [thread:$0]  %s669_s3, 2048, %s46_s11, [#allocation7], %s594_s18, %s594_s18, %s595_s19  }
  0x25   :  { %s549_s0 = scalar_lea.vmem %s63_s1, 16  ;;  %p554_p2 = scmp.lt.s32.totalorder %s63_s1, %s63_s1 }
  0x26   :  { %p550_p1 = scmp.ne.s32.totalorder %s63_s1, %s549_s0  ;;  %p555_p3 = scmp.lt.s32.totalorder %s549_s0, %s549_s0 }
  0x28   :  { %p556_p4 = por %p555_p3, %p554_p2 }
  0x2a   :  { %p557_p5 = pnand %p556_p4, %p550_p1 }
  0x2c   :  { %560 = shalt.err (!%p557_p5)
}
  0x2d   :  { %s596_s6 = smov [#allocation9]  }
  0x2e   :  { %65 = dma.vmem_to_smem %s63_s1, 16, %s596_s6, [#allocation5]  }
  0x2f   :  { %581 = dma.done.wait [#allocation3], 128  }
  0x30   :  { %582 = vsyncadd [#allocation3], 4294967168 }
  0x31   :  { %583 = dma.done.wait [#allocation7], 2560  }
  0x32   :  { %584 = vsyncadd [#allocation7], 4294964736 }
  0x33   :  { %585 = dma.done.wait [#allocation5], 16  }
  0x34   :  { %586 = vsyncadd [#allocation5], 4294967280 }
  0x35   :  { %78 = sfence }
  0x36   :  { %v463_v0 = vld [vmem:[#allocation6 + $0x14] ss:$8 sps:$4 sm:$0xff]   ;;  %v465_v1 = vld [vmem:[#allocation6 + $0x10] ss:$8 sps:$4 sm:$0xff]   ;;  %v597_v2 = vmov 0   ;;  %vm118_vm0 = vcmask 261120   ;;  %v88_v23 = vlaneseq }
  0x37   :  { %154 = vmatprep.mubr.bf16.mxu0 %v597_v2  ;;  %134 = vmatprep.subr.bf16.mxu0 %v463_v0  ;;  %v466_v3 = vld [vmem:[#allocation6 + $0x4] ss:$8 sps:$4 sm:$0xff]   ;;  %v468_v4 = vld [vmem:[#allocation6] ss:$8 sps:$4 sm:$0xff]   ;;  %v80_v5 = vld [vmem:[#allocation2] sm:$0xff]  ;;  %s429_s28 = sld [smem:[#allocation9 + $0x1]] }
  0x38   :  { %135 = vmatpush1.bf16.msra.mxu0 %v465_v1  ;;  %v469_v6 = vld [vmem:[#allocation8 + $0x78] sm:$0xff]   ;;  %v471_v8 = vld [vmem:[#allocation8 + $0x70] sm:$0xff]   ;;  %v81_v9 = vpack.c.bf16 %v80_v5, %v80_v5  ;;  %v473_v11 = vld [vmem:[#allocation8 + $0x68] sm:$0xff]   ;;  %v89_v24 = vshrl.u32 %v88_v23, 7  ;;  %s351_s29 = sld [smem:[#allocation9]]  ;;  %v367_v53 = vand.u32 127, %v88_v23 }
  0x39   :  { %136 = vmatprep.subr.bf16.mxu0 %v466_v3  ;;  %v470_v7 = vld [vmem:[#allocation8 + $0x38] sm:$0xff]   ;;  %431 = vmatprep.subr.bf16.mxu1 %v469_v6  ;;  %v472_v10 = vld [vmem:[#allocation8 + $0x30] sm:$0xff]   ;;  %v474_v12 = vld [vmem:[#allocation8 + $0x28] sm:$0xff]   ;;  %vm373_vm1 = vcmask 57344  }
  0x3a   :  { %432 = vmatpush3.bf16.msra.mxu1 %v470_v7  ;;  %v475_v13 = vld [vmem:[#allocation8 + $0x60] sm:$0xff]   ;;  %v477_v15 = vld [vmem:[#allocation8 + $0x58] sm:$0xff]   ;;  %v479_v17 = vld [vmem:[#allocation8 + $0x50] sm:$0xff]   ;;  %v90_v25 = vsub.s32 0, %v89_v24  ;;  %v94_v27 = vsub.s32 1, %v89_v24  ;;  %v370_v58 = vsub.s32 %v367_v53, %v89_v24 }
  0x3b   :  { %433 = vmatprep.subr.bf16.mxu1 %v471_v8  ;;  %v476_v14 = vld [vmem:[#allocation8 + $0x20] sm:$0xff]   ;;  %v478_v16 = vld [vmem:[#allocation8 + $0x18] sm:$0xff]   ;;  %v480_v18 = vld [vmem:[#allocation8 + $0x10] sm:$0xff]  }
  0x3c   :  { %137 = vmatpush1.bf16.msra.mxu0 %v468_v4  ;;  %v481_v19 = vld [vmem:[#allocation8 + $0x48] sm:$0xff]   ;;  %v483_v21 = vld [vmem:[#allocation8 + $0x40] sm:$0xff]   ;;  %v86_v26 = vld [vmem:[%s668_s2] sm:$0x3] }
  0x3d   :  { %v482_v20 = vld [vmem:[#allocation8 + $0x8] sm:$0xff]   ;;  %v484_v22 = vld [vmem:[#allocation8] sm:$0xff]   ;;  %v91_v28 = vrot.slane %v86_v26, %v90_v25  ;;  %v95_v29 = vrot.slane %v86_v26, %v94_v27  ;;  %v410_v42 = vld [vmem:[%s670_s4] ss:$0 sm:$0xff]  ;;  %v363_v52 = vstv %s429_s28  ;;  %s598_s4 = smov [#allocation10]  }
  0x3e   :  { %434 = vmatpush3.bf16.msra.mxu1 %v472_v10  ;;  %v428_v47 = vld [vmem:[%s671_s5 + $0x1] ss:$0 sm:$0xff]  ;;  %v427_v50 = vld [vmem:[%s671_s5] ss:$0 sm:$0xff]  ;;  %v352_v56 = vstv %s351_s29  ;;  %s394_s5 = sshll.u32 %s598_s4, 4  ;;  %s395_s5 = int_to_ptr.vmem [resolvable:$true] %s394_s5 }
  0x3f   :  { %409 = vmatmul.mubr.msk.bf16.vlgmr.msra.gmra.mxu0 %vm118_vm0, %v81_v9  ;;  %435 = vmatprep.subr.bf16.mxu1 %v473_v11  ;;  %s561_s30 = scalar_lea.vmem %s395_s5, 32  ;;  %p566_p7 = scmp.lt.s32.totalorder %s395_s5, %s395_s5 }
  0x40   :  { %p562_p6 = scmp.ne.s32.totalorder %s395_s5, %s561_s30  ;;  %p567_p8 = scmp.lt.s32.totalorder %s561_s30, %s561_s30 }
  0x42   :  { %436 = vmatpush3.bf16.msra.mxu1 %v474_v12  ;;  %p568_p9 = por %p567_p8, %p566_p7 }
  0x43   :  { %437 = vmatprep.subr.bf16.mxu1 %v475_v13 }
  0x44   :  { %p569_p10 = pnand %p568_p9, %p562_p6 }
  0x46   :  { %438 = vmatpush3.bf16.msra.mxu1 %v476_v14 }
  0x47   :  { %439 = vmatprep.subr.bf16.mxu1 %v477_v15 }
  0x4a   :  { %440 = vmatpush3.bf16.msra.mxu1 %v478_v16 }
  0x4b   :  { %441 = vmatprep.subr.bf16.mxu1 %v479_v17 }
  0x4e   :  { %442 = vmatpush3.bf16.msra.mxu1 %v480_v18 }
  0x4f   :  { %443 = vmatprep.subr.bf16.mxu1 %v481_v19 }
  0x52   :  { %444 = vmatpush3.bf16.msra.mxu1 %v482_v20 }
  0x53   :  { %445 = vmatprep.subr.bf16.mxu1 %v483_v21 }
  0x56   :  { %446 = vmatpush3.bf16.msra.mxu1 %v484_v22 }
  0xff   :  { %v156_v30 = vpop.f32.mrf.mxu0 }
 0x100   :  { %v157_v31 = vadd.f32 %v156_v30, %v91_v28 }
 0x101   :  { %v158_v32 = vpop.f32.mrf.mxu0 }
 0x102   :  { %v159_v33 = vadd.f32 %v158_v32, %v95_v29  ;;  %v163_v34 = vmax.f32 %v157_v31, 0.0 }
 0x103   :  { %v160_v35 = vpop.f32.mrf.mxu0 }
 0x104   :  { %v164_v36 = vmax.f32 %v159_v33, 0.0  ;;  %v165_v39 = vpack.c.bf16 %v163_v34, %v163_v34 }
 0x105   :  { %v161_v37 = vpop.f32.mrf.mxu0 }
 0x106   :  { %v166_v38 = vpack.c.bf16 %v164_v36, %v164_v36 }
 0x108   :  { %334 = vmatprep.mubr.bf16.mxu1 %v166_v38 }
 0x109   :  { %335 = vmatmul.mubr.bf16.vlgmr.msra.gmra.mxu1 %v165_v39 }
 0x1c9   :  { %v447_v40 = vpop.f32.mrf.mxu1 }
 0x1cb   :  { %v448_v41 = vpop.f32.mrf.mxu1 }
 0x1cc   :  { %v449_v43 = vadd.f32 %v448_v41, %v447_v40 }
 0x1cd   :  { %v450_v44 = vpop.f32.mrf.mxu1 }
 0x1ce   :  { %v337_v45 = vadd.f32 %v449_v43, %v410_v42 }
 0x1cf   :  { %v451_v46 = vpop.f32.mrf.mxu1 }
 0x1d0   :  { %v342_v48 = vmax.f32 %v337_v45, 0.0 }
 0x1d2   :  { %v359_v49 = vmul.f32 %v428_v47, %v342_v48  ;;  %v348_v51 = vmul.f32 %v427_v50, %v342_v48 }
 0x1d4   :  { %360 = vadd.xlane.f32.xlu0 %v359_v49 }
 0x1d8   :  { %349 = vadd.xlane.f32.xlu0 %v348_v51 }
 0x25d   :  { %v361_v54 = vpop.xlane.xlu0 %360 }
 0x25e   :  { %v364_v55 = vadd.f32 %v363_v52, %v361_v54 }
 0x260   :  { %v430_v57 = vmul.f32 -1.442695, %v364_v55 }
 0x261   :  { %v350_v59 = vpop.xlane.xlu0 %349 }
 0x262   :  { %485 = vpow2.f32 %v430_v57  ;;  %v353_v60 = vadd.f32 %v352_v56, %v350_v59 }
 0x264   :  { %v371_v61 = vrot.slane %v353_v60, %v370_v58 }
 0x266   :  { %374 = vst.msk [vmem:[#allocation10] sm:$0x1] %vm373_vm1, %v371_v61 }
 0x26f   :  { %v486_v62 = vpop.eup %485 }
 0x270   :  { %v378_v63 = vadd.f32 1.0, %v486_v62 }
 0x272   :  { %487 = vrcp.f32 %v378_v63 }
 0x27f   :  { %v488_v0 = vpop.eup %487 }
 0x280   :  { %v385_v1 = vrot.slane %v488_v0, %v370_v58 }
 0x282   :  { %387 = vst.msk [vmem:[#allocation10 + $0x1] sm:$0x1] %vm373_vm1, %v385_v1 }
 0x283   :  { %572 = shalt.err (!%p569_p10)
}
 0x284   :  { %397 = dma.vmem_to_hbm [thread:$0]  %s395_s5, 32, %s673_s7, [#allocation4]  }
 0x285   :  { %587 = dma.done.wait [#allocation4], 32  }
 0x286   :  { %588 = vsyncadd [#allocation4], 4294967264 }
 0x287   :  { %401 = vsyncpa [#allocation3], 1 }
 0x288   :  { %402 = vsyncpa [#allocation7], 1 }
 0x289   :  { %403 = vsyncpa [#allocation4], 1 }
 0x28a   :  { %404 = vsyncpa [#allocation5], 1 }

</bundles_post_ra>
